<compile_context>
chip_gen: v6e
topology: v6e:2x2x1
jax: 0.10.0
libtpu: 0.0.40
codegen_flags: <defaults>
</compile_context>

<pallas_src>
import functools

import jax
import jax.numpy as jnp
from jax import lax
from jax.experimental import pallas as pl
from jax.experimental.pallas import tpu as pltpu


NEG_SLOPE = 0.2


# ---------------------------------------------------------------------------
# Fused kernel: grid = (phase, tile), phase slowest.
# ---------------------------------------------------------------------------

def _fused_kernel(x_ref, w_ref, b_ref, idx_ref, out_ref,
                  lat_ref, p_ref, gmax_ref, ginv_ref, *, neg_slope):
    # x_ref   : (tm, F) f32   row tile of the input (only meaningful in phase 0)
    # w_ref   : (1, F)  f32   linear weight (out_features = 1), resident
    # b_ref   : (1, 1)  f32   linear bias, resident
    # idx_ref : (1, tm) i32   segment ids for this row tile
    # out_ref : (1, tm) f32   softmax output row tile (written in phase 2 only)
    # lat_ref : (n_tiles, 1, tm) f32  latent rows, persistent VMEM scratch
    # p_ref   : (n_tiles, 1, tm) f32  exp rows, persistent VMEM scratch
    # gmax_ref: (G_pad, 1) f32  per-group running max
    # ginv_ref: (G_pad, 1) f32  per-group running sum, then exact reciprocal
    ph = pl.program_id(0)
    i = pl.program_id(1)

    g_pad = gmax_ref.shape[0]
    gids = lax.broadcasted_iota(jnp.int32, (g_pad, 1), 0)       # (G, 1) group ids
    idx = idx_ref[...]                                           # (1, tm) int32
    onehot = idx == gids                                         # (G, tm) bool

    @pl.when(ph == 0)
    def _linear_and_group_max():
        @pl.when(i == 0)
        def _init():
            gmax_ref[...] = jnp.full(gmax_ref.shape, -jnp.inf, jnp.float32)
            ginv_ref[...] = jnp.zeros(ginv_ref.shape, jnp.float32)

        # LazyLinear(1): contract the feature axes -> lane-dense (1, tm).
        lat = lax.dot_general(
            w_ref[...], x_ref[...],
            dimension_numbers=(((1,), (1,)), ((), ())),
            preferred_element_type=jnp.float32) + b_ref[...]
        lat = jnp.where(lat >= 0.0, lat, neg_slope * lat)        # LeakyReLU(0.2)
        lat_ref[i] = lat

        # Running per-group max (padded rows carry id -1 -> never match).
        tile_max = jnp.max(jnp.where(onehot, lat, -jnp.inf),
                           axis=1, keepdims=True)                # (G, 1)
        gmax_ref[...] = jnp.maximum(gmax_ref[...], tile_max)

    @pl.when(ph == 1)
    def _exp_and_group_sum():
        lat = lat_ref[i]                                         # (1, tm)
        # Gather each row's group max via one-hot select + sublane sum.
        row_max = jnp.sum(jnp.where(onehot, gmax_ref[...], 0.0),
                          axis=0, keepdims=True)                 # (1, tm)
        p = jnp.exp(lat - row_max)
        p_ref[i] = p
        tile_sum = jnp.sum(jnp.where(onehot, p, 0.0),
                           axis=1, keepdims=True)                # (G, 1)
        ginv_ref[...] = ginv_ref[...] + tile_sum

        @pl.when(i == pl.num_programs(1) - 1)
        def _finalize():
            s = ginv_ref[...]
            # Exact per-group reciprocal (G_pad values); guard empty groups.
            ginv_ref[...] = jnp.where(s > 0.0, 1.0 / s, 0.0)

    @pl.when(ph == 2)
    def _normalize():
        p = p_ref[i]                                             # (1, tm)
        row_inv = jnp.sum(jnp.where(onehot, ginv_ref[...], 0.0),
                          axis=0, keepdims=True)                 # (1, tm)
        out_ref[...] = p * row_inv


# ---------------------------------------------------------------------------
# Wrapper
# ---------------------------------------------------------------------------

def _round_up(x, m):
    return ((x + m - 1) // m) * m


def _pick_tile(n_pad):
    # Large tiles so the HBM-bound linear phase amortizes per-step overhead;
    # must divide n_pad (a multiple of 128).
    for t in (512, 256, 128):
        if n_pad % t == 0:
            return t
    return 128


def _vmem_limit_bytes(tm, f, n_pad, g_pad, n_tiles):
    est = (2 * tm * f * 4                # x tile, double buffered
           + 2 * 8 * f * 4               # weight row (sublane padded)
           + 4 * 8 * tm * 4              # idx + out tiles, double buffered
           + 2 * n_tiles * 8 * tm * 4    # latent + p scratch rows
           + 2 * g_pad * 128 * 4         # gmax + ginv columns (lane padded)
           + 8 * tm * g_pad * 4          # live (G_pad, tm) temporaries
           + (4 << 20))                  # headroom
    # Cap at 40 MiB: safe inside v7x's 64 MiB physical VMEM, trivially fine
    # on v5e/v6e (128 MiB).
    return int(min(max(est, 16 << 20), 40 << 20))


def attention_model(x, index, weight, bias, num_segments=None):
    """x: (N, F) f32, index: (N,) int, weight: (1, F) f32, bias: (1,) f32.

    Returns scatter_softmax(leaky_relu(linear(x)), index, dim=0) of shape (N, 1).
    `num_segments` must be >= max(index) + 1; if None it is computed from
    `index` (requires a concrete array, i.e. outside jit).
    """
    n, f = x.shape
    if num_segments is None:
        num_segments = int(jax.device_get(jnp.max(index))) + 1

    n_pad = max(_round_up(n, 128), 128)
    tm = _pick_tile(n_pad)
    n_tiles = n_pad // tm
    g_pad = max(_round_up(int(num_segments), 128), 128)

    x_f = x.astype(jnp.float32)
    idx_i = index.astype(jnp.int32)                 # int32 compares: exact ids
    if n_pad != n:
        x_f = jnp.pad(x_f, ((0, n_pad - n), (0, 0)))
        # Padded rows get sentinel group -1: they never join a real group.
        idx_i = jnp.pad(idx_i, (0, n_pad - n), constant_values=-1)
    idx_row = idx_i.reshape(1, n_pad)
    w2d = weight.reshape(1, f).astype(jnp.float32)
    b2d = bias.reshape(1, 1).astype(jnp.float32)

    kernel = functools.partial(_fused_kernel, neg_slope=NEG_SLOPE)

    out_row = pl.pallas_call(
        kernel,
        out_shape=jax.ShapeDtypeStruct((1, n_pad), jnp.float32),
        grid_spec=pltpu.PrefetchScalarGridSpec(
            num_scalar_prefetch=0,
            grid=(3, n_tiles),                      # (phase, tile), phase slowest
            in_specs=[
                # x: real tile only in phase 0; collapses to block 0 afterwards
                # so x is streamed from HBM exactly once.
                pl.BlockSpec((tm, f), lambda ph, i: (jnp.where(ph == 0, i, 0), 0)),
                pl.BlockSpec((1, f), lambda ph, i: (0, 0)),      # weight, resident
                pl.BlockSpec((1, 1), lambda ph, i: (0, 0)),      # bias, resident
                pl.BlockSpec((1, tm), lambda ph, i: (0, i)),     # segment-id tile
            ],
            # Output block only advances in phase 2 -> each HBM block gets
            # exactly one writeback, carrying the phase-2 (correct) data.
            out_specs=pl.BlockSpec((1, tm),
                                   lambda ph, i: (0, jnp.where(ph == 2, i, 0))),
            scratch_shapes=[
                pltpu.VMEM((n_tiles, 1, tm), jnp.float32),       # latent rows
                pltpu.VMEM((n_tiles, 1, tm), jnp.float32),       # p rows
                pltpu.VMEM((g_pad, 1), jnp.float32),             # group max
                pltpu.VMEM((g_pad, 1), jnp.float32),             # group sum -> 1/sum
            ]),
        compiler_params=pltpu.CompilerParams(
            # Cross-phase/group dependencies -> sequential grid (see header).
            dimension_semantics=("arbitrary", "arbitrary"),
            vmem_limit_bytes=_vmem_limit_bytes(tm, f, n_pad, g_pad, n_tiles)),
    )(x_f, w2d, b2d, idx_row)

    return out_row[0, :n].reshape(n, 1)


# ---------------------------------------------------------------------------
# Pure-JAX reference (PyTorch forward: linear -> LeakyReLU -> scatter_softmax dim 0)
# ---------------------------------------------------------------------------

def attention_model_ref(x, index, weight, bias):
    latent = x.astype(jnp.float32) @ weight.T + bias                  # (N, 1)
    latent = jnp.where(latent >= 0.0, latent, NEG_SLOPE * latent)
    l = latent[:, 0]
    mask = index[:, None] == index[None, :]                           # (N, N)
    gmax = jnp.max(jnp.where(mask, l[None, :], -jnp.inf), axis=1)     # (N,)
    p = jnp.exp(l - gmax)
    denom = jnp.sum(jnp.where(mask, p[None, :], 0.0), axis=1)
    return (p / denom).reshape(-1, 1)


if __name__ == "__main__":
    N, F = 8, 32
    key = jax.random.PRNGKey(0)
    kx, kw, kb, ki = jax.random.split(key, 4)

    x = jax.random.normal(kx, (N, F), dtype=jnp.float32)
    index = jax.random.randint(ki, (N,), 0, 3, dtype=jnp.int32)

    # Deterministic "LazyLinear(1)" parameters (in_features=F, out_features=1)
    weight = jax.random.normal(kw, (1, F), dtype=jnp.float32) * (1.0 / jnp.sqrt(F))
    bias = jax.random.normal(kb, (1,), dtype=jnp.float32) * 0.1

    out = attention_model(x, index, weight, bias, num_segments=3)
    out = jax.block_until_ready(out)

    ref = attention_model_ref(x, index, weight, bias)
    assert out.shape == (N, 1) and out.dtype == jnp.float32
    # Tolerance covers possible MXU f32 matmul pass differences vs XLA's dot.
    assert jnp.allclose(out, ref, atol=1e-3, rtol=1e-3), (out, ref)

    print("KERNEL_OK")
</pallas_src>

<mosaic_0001>
module attributes {stable_mosaic.version = 11 : i64} {
  func.func @_fused_kernel(%arg0: i32, %arg1: i32, %arg2: memref<128x32xf32, #tpu.memory_space<vmem>>, %arg3: memref<1x32xf32, #tpu.memory_space<vmem>>, %arg4: memref<1x1xf32, #tpu.memory_space<vmem>>, %arg5: memref<1x128xi32, #tpu.memory_space<vmem>>, %arg6: memref<1x128xf32, #tpu.memory_space<vmem>>, %arg7: memref<1x1x128xf32, #tpu.memory_space<vmem>>, %arg8: memref<1x1x128xf32, #tpu.memory_space<vmem>>, %arg9: memref<128x1xf32, #tpu.memory_space<vmem>>, %arg10: memref<128x1xf32, #tpu.memory_space<vmem>>) attributes {dimension_semantics = [#tpu.dimension_semantics<arbitrary>, #tpu.dimension_semantics<arbitrary>], iteration_bounds = array<i64: 3, 1>, scalar_prefetch = 0 : i64, scratch_operands = 4 : i64, tpu.core_type = #tpu.core_type<tc>, window_params = [{transform_indices = @transform_0, window_bounds = array<i64: 128, 32>}, {pipeline_mode = #tpu.pipeline_mode<synchronous>, transform_indices = @transform_1, window_bounds = array<i64: 1, 32>}, {pipeline_mode = #tpu.pipeline_mode<synchronous>, transform_indices = @transform_2, window_bounds = array<i64: 1, 1>}, {transform_indices = @transform_3, window_bounds = array<i64: 1, 128>}, {transform_indices = @transform_4, window_bounds = array<i64: 1, 128>}]} {
    %0 = tpu.iota {dimensions = array<i32: 0>} : vector<128x1xi32>
    %c0 = arith.constant 0 : index
    %c0_0 = arith.constant 0 : index
    %1 = vector.load %arg5[%c0, %c0_0] : memref<1x128xi32, #tpu.memory_space<vmem>>, vector<1x128xi32>
    %2 = vector.broadcast %1 : vector<1x128xi32> to vector<128x128xi32>
    %3 = vector.broadcast %0 : vector<128x1xi32> to vector<128x128xi32>
    %4 = arith.cmpi eq, %2, %3 : vector<128x128xi32>
    %c0_i32 = arith.constant 0 : i32
    %5 = arith.cmpi eq, %arg0, %c0_i32 : i32
    %6 = arith.extui %5 : i1 to i32
    %c0_i32_1 = arith.constant 0 : i32
    %7 = arith.cmpi ne, %6, %c0_i32_1 : i32
    scf.if %7 {
      %c0_i32_4 = arith.constant 0 : i32
      %14 = arith.cmpi eq, %arg1, %c0_i32_4 : i32
      %15 = arith.extui %14 : i1 to i32
      %c0_i32_5 = arith.constant 0 : i32
      %16 = arith.cmpi ne, %15, %c0_i32_5 : i32
      scf.if %16 {
        %cst_22 = arith.constant 0xFF800000 : f32
        %41 = vector.broadcast %cst_22 : f32 to vector<128x1xf32>
        %c0_23 = arith.constant 0 : index
        %c0_24 = arith.constant 0 : index
        %42 = vector.load %arg9[%c0_23, %c0_24] : memref<128x1xf32, #tpu.memory_space<vmem>>, vector<128x1xf32>
        tpu.vector_store %arg9[%c0_23, %c0_24], %41 {strides = array<i32>} : memref<128x1xf32, #tpu.memory_space<vmem>>, vector<128x1xf32>,
        %cst_25 = arith.constant 0.000000e+00 : f32
        %43 = vector.broadcast %cst_25 : f32 to vector<128x1xf32>
        %c0_26 = arith.constant 0 : index
        %c0_27 = arith.constant 0 : index
        %44 = vector.load %arg10[%c0_26, %c0_27] : memref<128x1xf32, #tpu.memory_space<vmem>>, vector<128x1xf32>
        tpu.vector_store %arg10[%c0_26, %c0_27], %43 {strides = array<i32>} : memref<128x1xf32, #tpu.memory_space<vmem>>, vector<128x1xf32>,
      } else {
      }
      %c0_6 = arith.constant 0 : index
      %c0_7 = arith.constant 0 : index
      %17 = vector.load %arg3[%c0_6, %c0_7] : memref<1x32xf32, #tpu.memory_space<vmem>>, vector<1x32xf32>
      %c0_8 = arith.constant 0 : index
      %c0_9 = arith.constant 0 : index
      %18 = vector.load %arg2[%c0_8, %c0_9] : memref<128x32xf32, #tpu.memory_space<vmem>>, vector<128x32xf32>
      %cst = arith.constant dense<0.000000e+00> : vector<1x128xf32>
      %19 = tpu.matmul %17, %18, %cst {dimension_numbers = #tpu.dot_dimension_numbers<[1], [1], [0], [0], [0, 0, 1, 0], [], []>} : vector<1x32xf32>, vector<128x32xf32>, vector<1x128xf32> -> vector<1x128xf32>
      %c0_10 = arith.constant 0 : index
      %c0_11 = arith.constant 0 : index
      %20 = vector.load %arg4[%c0_10, %c0_11] : memref<1x1xf32, #tpu.memory_space<vmem>>, vector<1x1xf32>
      %21 = vector.broadcast %20 : vector<1x1xf32> to vector<1x128xf32>
      %22 = arith.addf %19, %21 : vector<1x128xf32>
      %cst_12 = arith.constant 0.000000e+00 : f32
      %23 = vector.broadcast %cst_12 : f32 to vector<1x128xf32>
      %24 = arith.cmpf oge, %22, %23 : vector<1x128xf32>
      %cst_13 = arith.constant 2.000000e-01 : f32
      %25 = vector.broadcast %cst_13 : f32 to vector<1x128xf32>
      %26 = arith.mulf %25, %22 : vector<1x128xf32>
      %27 = arith.select %24, %22, %26 : vector<1x128xi1>, vector<1x128xf32>
      %28 = arith.index_cast %arg1 : i32 to index
      %c0_14 = arith.constant 0 : index
      %c0_15 = arith.constant 0 : index
      %29 = vector.load %arg7[%28, %c0_14, %c0_15] : memref<1x1x128xf32, #tpu.memory_space<vmem>>, vector<1x1x128xf32>
      %30 = vector.shape_cast %29 : vector<1x1x128xf32> to vector<1x128xf32>
      %31 = vector.shape_cast %27 : vector<1x128xf32> to vector<1x1x128xf32>
      tpu.vector_store %arg7[%28, %c0_14, %c0_15], %31 {strides = array<i32>} : memref<1x1x128xf32, #tpu.memory_space<vmem>>, vector<1x1x128xf32>,
      %cst_16 = arith.constant 0xFF800000 : f32
      %32 = vector.shape_cast %27 : vector<1x128xf32> to vector<1x128xf32>
      %33 = vector.broadcast %32 : vector<1x128xf32> to vector<128x128xf32>
      %34 = vector.broadcast %cst_16 : f32 to vector<128x128xf32>
      %35 = arith.select %4, %33, %34 : vector<128x128xi1>, vector<128x128xf32>
      %cst_17 = arith.constant dense<0xFF800000> : vector<128xf32>
      %36 = vector.multi_reduction <maximumf>, %35, %cst_17 [1] : vector<128x128xf32> to vector<128xf32>
      %37 = vector.shape_cast %36 : vector<128xf32> to vector<128x1xf32>
      %c0_18 = arith.constant 0 : index
      %c0_19 = arith.constant 0 : index
      %38 = vector.load %arg9[%c0_18, %c0_19] : memref<128x1xf32, #tpu.memory_space<vmem>>, vector<128x1xf32>
      %39 = arith.maximumf %38, %37 : vector<128x1xf32>
      %c0_20 = arith.constant 0 : index
      %c0_21 = arith.constant 0 : index
      %40 = vector.load %arg9[%c0_20, %c0_21] : memref<128x1xf32, #tpu.memory_space<vmem>>, vector<128x1xf32>
      tpu.vector_store %arg9[%c0_20, %c0_21], %39 {strides = array<i32>} : memref<128x1xf32, #tpu.memory_space<vmem>>, vector<128x1xf32>,
    } else {
    }
    %c1_i32 = arith.constant 1 : i32
    %8 = arith.cmpi eq, %arg0, %c1_i32 : i32
    %9 = arith.extui %8 : i1 to i32
    %c0_i32_2 = arith.constant 0 : i32
    %10 = arith.cmpi ne, %9, %c0_i32_2 : i32
    scf.if %10 {
      %14 = arith.index_cast %arg1 : i32 to index
      %c0_4 = arith.constant 0 : index
      %c0_5 = arith.constant 0 : index
      %15 = vector.load %arg7[%14, %c0_4, %c0_5] : memref<1x1x128xf32, #tpu.memory_space<vmem>>, vector<1x1x128xf32>
      %16 = vector.shape_cast %15 : vector<1x1x128xf32> to vector<1x128xf32>
      %c0_6 = arith.constant 0 : index
      %c0_7 = arith.constant 0 : index
      %17 = vector.load %arg9[%c0_6, %c0_7] : memref<128x1xf32, #tpu.memory_space<vmem>>, vector<128x1xf32>
      %cst = arith.constant 0.000000e+00 : f32
      %18 = vector.shape_cast %17 : vector<128x1xf32> to vector<128x1xf32>
      %19 = vector.broadcast %18 : vector<128x1xf32> to vector<128x128xf32>
      %20 = vector.broadcast %cst : f32 to vector<128x128xf32>
      %21 = arith.select %4, %19, %20 : vector<128x128xi1>, vector<128x128xf32>
      %cst_8 = arith.constant dense<0.000000e+00> : vector<128xf32>
      %22 = vector.multi_reduction <add>, %21, %cst_8 [0] : vector<128x128xf32> to vector<128xf32>
      %23 = vector.shape_cast %22 : vector<128xf32> to vector<1x128xf32>
      %24 = arith.subf %16, %23 : vector<1x128xf32>
      %25 = math.exp %24 : vector<1x128xf32>
      %26 = arith.index_cast %arg1 : i32 to index
      %c0_9 = arith.constant 0 : index
      %c0_10 = arith.constant 0 : index
      %27 = vector.load %arg8[%26, %c0_9, %c0_10] : memref<1x1x128xf32, #tpu.memory_space<vmem>>, vector<1x1x128xf32>
      %28 = vector.shape_cast %27 : vector<1x1x128xf32> to vector<1x128xf32>
      %29 = vector.shape_cast %25 : vector<1x128xf32> to vector<1x1x128xf32>
      tpu.vector_store %arg8[%26, %c0_9, %c0_10], %29 {strides = array<i32>} : memref<1x1x128xf32, #tpu.memory_space<vmem>>, vector<1x1x128xf32>,
      %cst_11 = arith.constant 0.000000e+00 : f32
      %30 = vector.shape_cast %25 : vector<1x128xf32> to vector<1x128xf32>
      %31 = vector.broadcast %30 : vector<1x128xf32> to vector<128x128xf32>
      %32 = vector.broadcast %cst_11 : f32 to vector<128x128xf32>
      %33 = arith.select %4, %31, %32 : vector<128x128xi1>, vector<128x128xf32>
      %cst_12 = arith.constant dense<0.000000e+00> : vector<128xf32>
      %34 = vector.multi_reduction <add>, %33, %cst_12 [1] : vector<128x128xf32> to vector<128xf32>
      %35 = vector.shape_cast %34 : vector<128xf32> to vector<128x1xf32>
      %c0_13 = arith.constant 0 : index
      %c0_14 = arith.constant 0 : index
      %36 = vector.load %arg10[%c0_13, %c0_14] : memref<128x1xf32, #tpu.memory_space<vmem>>, vector<128x1xf32>
      %37 = arith.addf %36, %35 : vector<128x1xf32>
      %c0_15 = arith.constant 0 : index
      %c0_16 = arith.constant 0 : index
      %38 = vector.load %arg10[%c0_15, %c0_16] : memref<128x1xf32, #tpu.memory_space<vmem>>, vector<128x1xf32>
      tpu.vector_store %arg10[%c0_15, %c0_16], %37 {strides = array<i32>} : memref<128x1xf32, #tpu.memory_space<vmem>>, vector<128x1xf32>,
      %c0_i32_17 = arith.constant 0 : i32
      %39 = arith.cmpi eq, %arg1, %c0_i32_17 : i32
      %40 = arith.extui %39 : i1 to i32
      %c0_i32_18 = arith.constant 0 : i32
      %41 = arith.cmpi ne, %40, %c0_i32_18 : i32
      scf.if %41 {
        %c0_19 = arith.constant 0 : index
        %c0_20 = arith.constant 0 : index
        %42 = vector.load %arg10[%c0_19, %c0_20] : memref<128x1xf32, #tpu.memory_space<vmem>>, vector<128x1xf32>
        %cst_21 = arith.constant 0.000000e+00 : f32
        %43 = vector.broadcast %cst_21 : f32 to vector<128x1xf32>
        %44 = arith.cmpf ogt, %42, %43 : vector<128x1xf32>
        %cst_22 = arith.constant 1.000000e+00 : f32
        %45 = vector.broadcast %cst_22 : f32 to vector<128x1xf32>
        %46 = arith.divf %45, %42 : vector<128x1xf32>
        %cst_23 = arith.constant 0.000000e+00 : f32
        %47 = vector.broadcast %cst_23 : f32 to vector<128x1xf32>
        %48 = arith.select %44, %46, %47 : vector<128x1xi1>, vector<128x1xf32>
        %c0_24 = arith.constant 0 : index
        %c0_25 = arith.constant 0 : index
        %49 = vector.load %arg10[%c0_24, %c0_25] : memref<128x1xf32, #tpu.memory_space<vmem>>, vector<128x1xf32>
        tpu.vector_store %arg10[%c0_24, %c0_25], %48 {strides = array<i32>} : memref<128x1xf32, #tpu.memory_space<vmem>>, vector<128x1xf32>,
      } else {
      }
    } else {
    }
    %c2_i32 = arith.constant 2 : i32
    %11 = arith.cmpi eq, %arg0, %c2_i32 : i32
    %12 = arith.extui %11 : i1 to i32
    %c0_i32_3 = arith.constant 0 : i32
    %13 = arith.cmpi ne, %12, %c0_i32_3 : i32
    scf.if %13 {
      %14 = arith.index_cast %arg1 : i32 to index
      %c0_4 = arith.constant 0 : index
      %c0_5 = arith.constant 0 : index
      %15 = vector.load %arg8[%14, %c0_4, %c0_5] : memref<1x1x128xf32, #tpu.memory_space<vmem>>, vector<1x1x128xf32>
      %16 = vector.shape_cast %15 : vector<1x1x128xf32> to vector<1x128xf32>
      %c0_6 = arith.constant 0 : index
      %c0_7 = arith.constant 0 : index
      %17 = vector.load %arg10[%c0_6, %c0_7] : memref<128x1xf32, #tpu.memory_space<vmem>>, vector<128x1xf32>
      %cst = arith.constant 0.000000e+00 : f32
      %18 = vector.shape_cast %17 : vector<128x1xf32> to vector<128x1xf32>
      %19 = vector.broadcast %18 : vector<128x1xf32> to vector<128x128xf32>
      %20 = vector.broadcast %cst : f32 to vector<128x128xf32>
      %21 = arith.select %4, %19, %20 : vector<128x128xi1>, vector<128x128xf32>
      %cst_8 = arith.constant dense<0.000000e+00> : vector<128xf32>
      %22 = vector.multi_reduction <add>, %21, %cst_8 [0] : vector<128x128xf32> to vector<128xf32>
      %23 = vector.shape_cast %22 : vector<128xf32> to vector<1x128xf32>
      %24 = arith.mulf %16, %23 : vector<1x128xf32>
      %c0_9 = arith.constant 0 : index
      %c0_10 = arith.constant 0 : index
      %25 = vector.load %arg6[%c0_9, %c0_10] : memref<1x128xf32, #tpu.memory_space<vmem>>, vector<1x128xf32>
      tpu.vector_store %arg6[%c0_9, %c0_10], %24 {strides = array<i32>} : memref<1x128xf32, #tpu.memory_space<vmem>>, vector<1x128xf32>,
    } else {
    }
    return
  }
  func.func @transform_0(%arg0: i32, %arg1: i32) -> (i32, i32) {
    %c0_i32 = arith.constant 0 : i32
    %0 = arith.cmpi eq, %arg0, %c0_i32 : i32
    %c0_i32_0 = arith.constant 0 : i32
    %1 = arith.select %0, %arg1, %c0_i32_0 : i32
    %c0_i32_1 = arith.constant 0 : i32
    %c0_i32_2 = arith.constant 0 : i32
    return %1, %c0_i32_1 : i32, i32
  }
  func.func @transform_1(%arg0: i32, %arg1: i32) -> (i32, i32) {
    %c0_i32 = arith.constant 0 : i32
    %c0_i32_0 = arith.constant 0 : i32
    %c0_i32_1 = arith.constant 0 : i32
    return %c0_i32, %c0_i32_0 : i32, i32
  }
  func.func @transform_2(%arg0: i32, %arg1: i32) -> (i32, i32) {
    %c0_i32 = arith.constant 0 : i32
    %c0_i32_0 = arith.constant 0 : i32
    %c0_i32_1 = arith.constant 0 : i32
    return %c0_i32, %c0_i32_0 : i32, i32
  }
  func.func @transform_3(%arg0: i32, %arg1: i32) -> (i32, i32) {
    %c0_i32 = arith.constant 0 : i32
    %c0_i32_0 = arith.constant 0 : i32
    return %c0_i32, %arg1 : i32, i32
  }
  func.func @transform_4(%arg0: i32, %arg1: i32) -> (i32, i32) {
    %c2_i32 = arith.constant 2 : i32
    %0 = arith.cmpi eq, %arg0, %c2_i32 : i32
    %c0_i32 = arith.constant 0 : i32
    %1 = arith.select %0, %arg1, %c0_i32 : i32
    %c0_i32_0 = arith.constant 0 : i32
    %c0_i32_1 = arith.constant 0 : i32
    return %c0_i32_0, %1 : i32, i32
  }
}

</mosaic_0001>

<bundles_post_ra>
// kernel: tpu_custom_call.1
= control target key start
LH: loop header
LB: loop body
LE: loop exit
PB: predicated region body
PF: predicated region fallthrough
CT: control target
= control target key end

     0   :  { %s1926_s0 = inlined_call_operand.vmem [shape: f32[128,32], index: 0, kind: input, shape index: {}]   ;;  %s1927_s1 = inlined_call_operand.vmem [shape: f32[1,32], index: 1, kind: input, shape index: {}]   ;;  %s1928_s2 = inlined_call_operand.<no memory space> [shape: f32[1,1], index: 2, kind: input, shape index: {}]   ;;  %s1929_s3 = inlined_call_operand.vmem [shape: s32[1,128], index: 3, kind: input, shape index: {}]   ;;  %s1930_s4 = inlined_call_operand.hbm [shape: f32[1,128], index: 4, kind: output, shape index: {}]  }
   0x1   :  { %v9_v0 = vstv %s1928_s2 }
   0x2   :  { %10 = vst [vmem:[#allocation6] sm:$0x1] %v9_v0 }
   0x3   :  { %11 = vsyncpa [#allocation8], 0 }
   0x4   :  { %13 = vsyncpa [#allocation8 + $0x1], 0  ;;  %s1413_s17 = smov 0   ;;  %s1415_s18 = smov 0  }
   0x5   :  { %s1417_s19 = smov 0  }
   0x6 LB: > { %s1161_s2 = sadd.s32 4294967295, %s1376_s19   ;;  %s1162_s20 = sadd.s32 4294967294, %s1376_s19   ;;  %s1376_s19 = sphi %s1417_s19, %s19_s19   ;;  %s1372_s18 = sphi %s1415_s18, %s1951_s18   ;;  %s1368_s17 = sphi %s1413_s17, %s1950_s17  }
   0x7   : > { %s31_s21 = sadd.s32 1, %s1372_s18  ;;  %p1167_p0 = scmp.ge.s32.totalorder %s1376_s19, 1 }
   0x8   : > { %p33_p1 = scmp.ge.s32.totalorder %s31_s21, 3  ;;  %p200_p2 = scmp.lt.s32.totalorder %s1376_s19, 4 }
   0xa   : > { %s1953_s21 = smov (%p33_p1, %s31_s21), 0  ;;  %p201_p3 = pnand %p1167_p0, %p200_p2 }
   0xb   : > { %p1169_p4 = scmp.ne.s32.totalorder (!%p201_p3), %s1368_s17, 0 }
   0xc   : > { %204 = sbr.rel (%p201_p3) target bundleno = 1073 (0x431), region = 36 }
  0x11   : > { %v245_v1 = vlaneseq  ;;  %v1452_v7 = vld [vmem:[%s1929_s3] ss:$0 sm:$0xff] }
  0x13   : > { %v1435_v2 = vshrl.u32 %v245_v1, 7 }
  0x15   : > { %v1438_v3 = vadd.s32 8, %v1435_v2  ;;  %v1441_v4 = vadd.s32 16, %v1435_v2  ;;  %v1444_v5 = vadd.s32 24, %v1435_v2  ;;  %v1447_v6 = vadd.s32 32, %v1435_v2 }
  0x16   : > { %v1455_v8 = vadd.s32 40, %v1435_v2  ;;  %v1458_v9 = vadd.s32 48, %v1435_v2  ;;  %v1461_v10 = vadd.s32 56, %v1435_v2  ;;  %v1464_v11 = vadd.s32 64, %v1435_v2 }
  0x17   : > { %v1467_v12 = vadd.s32 72, %v1435_v2  ;;  %v1470_v13 = vadd.s32 80, %v1435_v2  ;;  %v1473_v14 = vadd.s32 88, %v1435_v2  ;;  %v1476_v15 = vadd.s32 96, %v1435_v2  ;;  %286 = sbr.rel (%p1169_p4) target bundleno = 479 (0x1df), region = 40 }
  0x18   : > { %v1479_v16 = vadd.s32 104, %v1435_v2  ;;  %v1482_v17 = vadd.s32 112, %v1435_v2  ;;  %v1485_v18 = vadd.s32 120, %v1435_v2  ;;  %vm267_vm0 = vcmp.eq.s32.totalorder %v1452_v7, %v1435_v2 }
  0x19   : > { %vm268_vm1 = vcmp.eq.s32.totalorder %v1452_v7, %v1438_v3  ;;  %vm269_vm2 = vcmp.eq.s32.totalorder %v1452_v7, %v1441_v4  ;;  %vm270_vm3 = vcmp.eq.s32.totalorder %v1452_v7, %v1444_v5  ;;  %vm271_vm4 = vcmp.eq.s32.totalorder %v1452_v7, %v1447_v6 }
  0x1a   : > { %vm272_vm5 = vcmp.eq.s32.totalorder %v1452_v7, %v1455_v8  ;;  %vm273_vm6 = vcmp.eq.s32.totalorder %v1452_v7, %v1458_v9  ;;  %vm274_vm7 = vcmp.eq.s32.totalorder %v1452_v7, %v1461_v10  ;;  %vm275_vm8 = vcmp.eq.s32.totalorder %v1452_v7, %v1464_v11 }
  0x1b   : > { %vm277_vm10 = vcmp.eq.s32.totalorder %v1452_v7, %v1470_v13  ;;  %vm1933_vm12 = vcmp.eq.s32.totalorder %v1452_v7, %v1476_v15  ;;  %vm1932_vm13 = vcmp.eq.s32.totalorder %v1452_v7, %v1479_v16  ;;  %vm1931_vm14 = vcmp.eq.s32.totalorder %v1452_v7, %v1482_v17 }
  0x1c   : > { %vm291_vm9 = vcmask 7168   ;;  %v340_v19 = vld [vmem:[%s1926_s0 + $0x78] sm:$0xff]  ;;  %vm351_vm11 = vcmask 261120   ;;  %v1378_v20 = vmov 0.0   ;;  %vm1379_vm15 = vmmov 0   ;;  %v339_v21 = vld [vmem:[%s1926_s0 + $0x70] sm:$0xff] }
  0x1d   : > { %308 = vst.msk [vmem:[#allocation5] sm:$0xff] %vm291_vm9, %v1378_v20  ;;  %309 = vst.msk [vmem:[#allocation5 + $0x8] sm:$0xff] %vm291_vm9, %v1378_v20  ;;  %1210 = vmatprep.subr.mxu0 %v1378_v20  ;;  %1242 = vmatprep.mubr.msk.f32.mxu0 %vm1379_vm15, %v1378_v20  ;;  %v1380_v22 = vmov 0   ;;  %v341_v23 = vld [vmem:[#allocation6] sm:$0x1]  ;;  %v338_v24 = vld [vmem:[%s1926_s0 + $0x68] sm:$0xff] }
  0x1e   : > { %310 = vst.msk [vmem:[#allocation5 + $0x10] sm:$0xff] %vm291_vm9, %v1378_v20  ;;  %311 = vst.msk [vmem:[#allocation5 + $0x18] sm:$0xff] %vm291_vm9, %v1378_v20  ;;  %1211 = vmatpush3.xpose.msk.msra.mxu0 %vm351_vm11, %v340_v19  ;;  %1287 = vset.pattern.permute.xlu0 %v1380_v22  ;;  %v337_v25 = vld [vmem:[%s1926_s0 + $0x60] sm:$0xff]  ;;  %v336_v26 = vld [vmem:[%s1926_s0 + $0x58] sm:$0xff]  ;;  %v349_v39 = vsub.s32 0, %v1435_v2  ;;  %v1381_v52 = vmov -inf  }
  0x1f   : > { %312 = vst.msk [vmem:[#allocation5 + $0x20] sm:$0xff] %vm291_vm9, %v1378_v20  ;;  %313 = vst.msk [vmem:[#allocation5 + $0x28] sm:$0xff] %vm291_vm9, %v1378_v20  ;;  %1212 = vmatprep.subr.mxu0 %v1378_v20  ;;  %344 = vperm.xlu0 %1287, %v341_v23   ;;  %v335_v27 = vld [vmem:[%s1926_s0 + $0x50] sm:$0xff]  ;;  %v334_v28 = vld [vmem:[%s1926_s0 + $0x48] sm:$0xff] }
  0x20   : > { %314 = vst.msk [vmem:[#allocation5 + $0x30] sm:$0xff] %vm291_vm9, %v1378_v20  ;;  %315 = vst.msk [vmem:[#allocation5 + $0x38] sm:$0xff] %vm291_vm9, %v1378_v20  ;;  %v333_v29 = vld [vmem:[%s1926_s0 + $0x40] sm:$0xff]  ;;  %v332_v30 = vld [vmem:[%s1926_s0 + $0x38] sm:$0xff] }
  0x21   : > { %316 = vst.msk [vmem:[#allocation5 + $0x40] sm:$0xff] %vm291_vm9, %v1378_v20  ;;  %317 = vst.msk [vmem:[#allocation5 + $0x48] sm:$0xff] %vm291_vm9, %v1378_v20  ;;  %v331_v31 = vld [vmem:[%s1926_s0 + $0x30] sm:$0xff]  ;;  %v330_v32 = vld [vmem:[%s1926_s0 + $0x28] sm:$0xff] }
  0x22   : > { %318 = vst.msk [vmem:[#allocation5 + $0x50] sm:$0xff] %vm291_vm9, %v1378_v20  ;;  %319 = vst.msk [vmem:[#allocation5 + $0x58] sm:$0xff] %vm291_vm9, %v1378_v20  ;;  %1213 = vmatpush3.xpose.msk.msra.mxu0 %vm351_vm11, %v339_v21  ;;  %v329_v33 = vld [vmem:[%s1926_s0 + $0x20] sm:$0xff]  ;;  %v328_v34 = vld [vmem:[%s1926_s0 + $0x18] sm:$0xff] }
  0x23   : > { %320 = vst.msk [vmem:[#allocation5 + $0x60] sm:$0xff] %vm291_vm9, %v1378_v20  ;;  %321 = vst.msk [vmem:[#allocation5 + $0x68] sm:$0xff] %vm291_vm9, %v1378_v20  ;;  %1214 = vmatprep.subr.mxu0 %v1378_v20  ;;  %v327_v35 = vld [vmem:[%s1926_s0 + $0x10] sm:$0xff]  ;;  %v326_v36 = vld [vmem:[%s1926_s0 + $0x8] sm:$0xff] }
  0x24   : > { %322 = vst.msk [vmem:[#allocation5 + $0x70] sm:$0xff] %vm291_vm9, %v1378_v20  ;;  %323 = vst.msk [vmem:[#allocation5 + $0x78] sm:$0xff] %vm291_vm9, %v1378_v20  ;;  %v325_v37 = vld [vmem:[%s1926_s0] sm:$0xff] }
  0x25   : > { %v324_v38 = vld [vmem:[%s1927_s1] sm:$0x1]  ;;  %293 = vst.msk [vmem:[#allocation4 + $0x8] sm:$0xff] %vm291_vm9, %v1381_v52  ;;  %292 = vst.msk [vmem:[#allocation4] sm:$0xff] %vm291_vm9, %v1381_v52 }
  0x26   : > { %1215 = vmatpush3.xpose.msk.msra.mxu0 %vm351_vm11, %v338_v24  ;;  %294 = vst.msk [vmem:[#allocation4 + $0x10] sm:$0xff] %vm291_vm9, %v1381_v52  ;;  %295 = vst.msk [vmem:[#allocation4 + $0x18] sm:$0xff] %vm291_vm9, %v1381_v52 }
  0x27   : > { %1216 = vmatprep.subr.mxu0 %v1378_v20  ;;  %296 = vst.msk [vmem:[#allocation4 + $0x20] sm:$0xff] %vm291_vm9, %v1381_v52  ;;  %297 = vst.msk [vmem:[#allocation4 + $0x28] sm:$0xff] %vm291_vm9, %v1381_v52 }
  0x28   : > { %298 = vst.msk [vmem:[#allocation4 + $0x30] sm:$0xff] %vm291_vm9, %v1381_v52  ;;  %299 = vst.msk [vmem:[#allocation4 + $0x38] sm:$0xff] %vm291_vm9, %v1381_v52 }
  0x29   : > { %300 = vst.msk [vmem:[#allocation4 + $0x40] sm:$0xff] %vm291_vm9, %v1381_v52  ;;  %301 = vst.msk [vmem:[#allocation4 + $0x48] sm:$0xff] %vm291_vm9, %v1381_v52 }
  0x2a   : > { %1217 = vmatpush3.xpose.msk.msra.mxu0 %vm351_vm11, %v337_v25  ;;  %302 = vst.msk [vmem:[#allocation4 + $0x50] sm:$0xff] %vm291_vm9, %v1381_v52  ;;  %303 = vst.msk [vmem:[#allocation4 + $0x58] sm:$0xff] %vm291_vm9, %v1381_v52 }
  0x2b   : > { %1218 = vmatprep.subr.mxu0 %v1378_v20  ;;  %304 = vst.msk [vmem:[#allocation4 + $0x60] sm:$0xff] %vm291_vm9, %v1381_v52  ;;  %305 = vst.msk [vmem:[#allocation4 + $0x68] sm:$0xff] %vm291_vm9, %v1381_v52 }
  0x2c   : > { %306 = vst.msk [vmem:[#allocation4 + $0x70] sm:$0xff] %vm291_vm9, %v1381_v52  ;;  %307 = vst.msk [vmem:[#allocation4 + $0x78] sm:$0xff] %vm291_vm9, %v1381_v52  ;;  %v531_v1 = vld [vmem:[#allocation4 + $0x8] sm:$0xff]  ;;  %v530_v19 = vld [vmem:[#allocation4] sm:$0xff] }
  0x2d   : > { %v532_v24 = vld [vmem:[#allocation4 + $0x10] sm:$0xff] }
  0x2e   : > { %1219 = vmatpush3.xpose.msk.msra.mxu0 %vm351_vm11, %v336_v26 }
  0x2f   : > { %1220 = vmatprep.subr.mxu0 %v1378_v20 }
  0x31   : > { %v540_v25 = vld [vmem:[#allocation4 + $0x50] sm:$0xff] }
  0x32   : > { %1221 = vmatpush3.xpose.msk.msra.mxu0 %vm351_vm11, %v335_v27 }
  0x33   : > { %1222 = vmatprep.subr.mxu0 %v1378_v20 }
  0x36   : > { %1223 = vmatpush3.xpose.msk.msra.mxu0 %vm351_vm11, %v334_v28 }
  0x37   : > { %1224 = vmatprep.subr.mxu0 %v1378_v20 }
  0x3a   : > { %1225 = vmatpush3.xpose.msk.msra.mxu0 %vm351_vm11, %v333_v29 }
  0x3b   : > { %1226 = vmatprep.subr.mxu0 %v1378_v20 }
  0x3e   : > { %1227 = vmatpush3.xpose.msk.msra.mxu0 %vm351_vm11, %v332_v30  ;;  %v533_v30 = vld [vmem:[#allocation4 + $0x18] sm:$0xff] }
  0x3f   : > { %1228 = vmatprep.subr.mxu0 %v1378_v20 }
  0x42   : > { %1229 = vmatpush3.xpose.msk.msra.mxu0 %vm351_vm11, %v331_v31  ;;  %v542_v31 = vld [vmem:[#allocation4 + $0x60] sm:$0xff] }
  0x43   : > { %1230 = vmatprep.subr.mxu0 %v1378_v20 }
  0x46   : > { %1231 = vmatpush3.xpose.msk.msra.mxu0 %vm351_vm11, %v330_v32 }
  0x47   : > { %1232 = vmatprep.subr.mxu0 %v1378_v20 }
  0x4a   : > { %1233 = vmatpush3.xpose.msk.msra.mxu0 %vm351_vm11, %v329_v33 }
  0x4b   : > { %1234 = vmatprep.subr.mxu0 %v1378_v20 }
  0x4e   : > { %1235 = vmatpush3.xpose.msk.msra.mxu0 %vm351_vm11, %v328_v34 }
  0x4f   : > { %1236 = vmatprep.subr.mxu0 %v1378_v20 }
  0x52   : > { %1237 = vmatpush3.xpose.msk.msra.mxu0 %vm351_vm11, %v327_v35 }
  0x53   : > { %1238 = vmatprep.subr.mxu0 %v1378_v20 }
  0x56   : > { %1239 = vmatpush3.xpose.msk.msra.mxu0 %vm351_vm11, %v326_v36  ;;  %v534_v36 = vld [vmem:[#allocation4 + $0x20] sm:$0xff] }
  0x57   : > { %1240 = vmatprep.subr.mxu0 %v1378_v20 }
  0x5a   : > { %1241 = vmatpush3.xpose.msk.msra.mxu0 %vm351_vm11, %v325_v37  ;;  %v544_v37 = vld [vmem:[#allocation4 + $0x70] sm:$0xff] }
  0x5d   : > { %1243 = vmatmul.mubr.msk.f32.vlgmr.msra.gmra.mxu0 %vm351_vm11, %v324_v38  ;;  %vm1934_vm11 = vcmp.eq.s32.totalorder %v1452_v7, %v1467_v12 }
  0x9a   : > { %v345_v40 = vpop.permute.xlu0 %344 }
  0x9b   : > { %v350_v41 = vrot.slane %v345_v40, %v349_v39 }
 0x11d   : > { %v469_v42 = vpop.f32.mrf.mxu0 }
 0x11e   : > { %v470_v43 = vadd.f32 %v469_v42, %v350_v41  ;;  %v535_v42 = vld [vmem:[#allocation4 + $0x28] sm:$0xff] }
 0x11f   : > { %v1244_v44 = vpop.f32.mrf.mxu0 }
 0x120   : > { %vm473_vm15 = vcmp.ge.f32.partialorder %v470_v43, 0.0  ;;  %v474_v45 = vmul.f32 0.2, %v470_v43 }
 0x122   : > { %v475_v46 = vsel %vm473_vm15, %v470_v43, %v474_v45  ;;  %vm1935_vm15 = vcmp.eq.s32.totalorder %v1452_v7, %v1473_v14  ;;  %v536_v45 = vld [vmem:[#allocation4 + $0x30] sm:$0xff] }
 0x123   : > { %477 = vst [vmem:[#allocation2] sm:$0x1] %v475_v46  ;;  %v481_v47 = vrot.slane %v475_v46, %v349_v39 }
 0x125   : > { %v483_v48 = vsel %vm268_vm1, %v481_v47, -inf  ;;  %v482_v49 = vsel %vm267_vm0, %v481_v47, -inf  ;;  %v484_v50 = vsel %vm269_vm2, %v481_v47, -inf  ;;  %v492_v51 = vsel %vm277_vm10, %v481_v47, -inf }
 0x126   : > { %500 = vmax.xlane.f32.xlu1 %v483_v48  ;;  %498 = vmax.xlane.f32.xlu0 %v482_v49  ;;  %v485_v53 = vsel %vm270_vm3, %v481_v47, -inf  ;;  %v494_v54 = vsel %vm1933_vm12, %v481_v47, -inf  ;;  %v486_v55 = vsel %vm271_vm4, %v481_v47, -inf  ;;  %v496_v56 = vsel %vm1931_vm14, %v481_v47, -inf  ;;  %v537_v48 = vld [vmem:[#allocation4 + $0x38] sm:$0xff] }
 0x127   : > { %v487_v57 = vsel %vm272_vm5, %v481_v47, -inf  ;;  %v488_v58 = vsel %vm273_vm6, %v481_v47, -inf  ;;  %v489_v59 = vsel %vm274_vm7, %v481_v47, -inf  ;;  %v490_v60 = vsel %vm275_vm8, %v481_v47, -inf }
 0x128   : > { %v491_v61 = vsel %vm1934_vm11, %v481_v47, -inf  ;;  %v493_v62 = vsel %vm1935_vm15, %v481_v47, -inf  ;;  %v495_v63 = vsel %vm1932_vm13, %v481_v47, -inf  ;;  %vm1936_vm14 = vcmp.eq.s32.totalorder %v1452_v7, %v1485_v18 }
 0x129   : > { %v497_v0 = vsel %vm1936_vm14, %v481_v47, -inf }
 0x12a   : > { %502 = vmax.xlane.f32.xlu1 %v484_v50  ;;  %518 = vmax.xlane.f32.xlu0 %v492_v51  ;;  %v538_v51 = vld [vmem:[#allocation4 + $0x40] sm:$0xff] }
 0x12e   : > { %504 = vmax.xlane.f32.xlu1 %v485_v53  ;;  %522 = vmax.xlane.f32.xlu0 %v494_v54  ;;  %v539_v54 = vld [vmem:[#allocation4 + $0x48] sm:$0xff] }
 0x132   : > { %506 = vmax.xlane.f32.xlu1 %v486_v55  ;;  %526 = vmax.xlane.f32.xlu0 %v496_v56 }
 0x136   : > { %508 = vmax.xlane.f32.xlu1 %v487_v57  ;;  %v541_v57 = vld [vmem:[#allocation4 + $0x58] sm:$0xff] }
 0x13a   : > { %510 = vmax.xlane.f32.xlu1 %v488_v58 }
 0x13e   : > { %512 = vmax.xlane.f32.xlu1 %v489_v59 }
 0x142   : > { %514 = vmax.xlane.f32.xlu1 %v490_v60  ;;  %v543_v60 = vld [vmem:[#allocation4 + $0x68] sm:$0xff] }
 0x146   : > { %516 = vmax.xlane.f32.xlu1 %v491_v61 }
 0x14a   : > { %520 = vmax.xlane.f32.xlu1 %v493_v62 }
 0x14e   : > { %524 = vmax.xlane.f32.xlu1 %v495_v63  ;;  %v545_v63 = vld [vmem:[#allocation4 + $0x78] sm:$0xff] }
 0x152   : > { %528 = vmax.xlane.f32.xlu1 %v497_v0 }
 0x1af   : > { %v501_v20 = vpop.xlane.xlu1 %500  ;;  %v499_v21 = vpop.xlane.xlu0 %498 }
 0x1b0   : > { %v547_v22 = vmax.f32 %v531_v1, %v501_v20  ;;  %v546_v23 = vmax.f32 %v530_v19, %v499_v21 }
 0x1b2   : > { %564 = vst.msk [vmem:[#allocation4 + $0x8] sm:$0xff] %vm291_vm9, %v547_v22  ;;  %563 = vst.msk [vmem:[#allocation4] sm:$0xff] %vm291_vm9, %v546_v23 }
 0x1b3   : > { %v503_v26 = vpop.xlane.xlu1 %502  ;;  %v519_v27 = vpop.xlane.xlu0 %518 }
 0x1b4   : > { %v548_v28 = vmax.f32 %v532_v24, %v503_v26  ;;  %v556_v29 = vmax.f32 %v540_v25, %v519_v27 }
 0x1b6   : > { %565 = vst.msk [vmem:[#allocation4 + $0x10] sm:$0xff] %vm291_vm9, %v548_v28  ;;  %573 = vst.msk [vmem:[#allocation4 + $0x50] sm:$0xff] %vm291_vm9, %v556_v29 }
 0x1b7   : > { %v505_v32 = vpop.xlane.xlu1 %504  ;;  %v523_v33 = vpop.xlane.xlu0 %522 }
 0x1b8   : > { %v549_v34 = vmax.f32 %v533_v30, %v505_v32  ;;  %v558_v35 = vmax.f32 %v542_v31, %v523_v33 }
 0x1ba   : > { %566 = vst.msk [vmem:[#allocation4 + $0x18] sm:$0xff] %vm291_vm9, %v549_v34  ;;  %575 = vst.msk [vmem:[#allocation4 + $0x60] sm:$0xff] %vm291_vm9, %v558_v35 }
 0x1bb   : > { %v507_v38 = vpop.xlane.xlu1 %506  ;;  %v527_v39 = vpop.xlane.xlu0 %526 }
 0x1bc   : > { %v550_v40 = vmax.f32 %v534_v36, %v507_v38  ;;  %v560_v41 = vmax.f32 %v544_v37, %v527_v39 }
 0x1be   : > { %567 = vst.msk [vmem:[#allocation4 + $0x20] sm:$0xff] %vm291_vm9, %v550_v40  ;;  %577 = vst.msk [vmem:[#allocation4 + $0x70] sm:$0xff] %vm291_vm9, %v560_v41 }
 0x1bf   : > { %v509_v43 = vpop.xlane.xlu1 %508 }
 0x1c0   : > { %v551_v44 = vmax.f32 %v535_v42, %v509_v43 }
 0x1c2   : > { %568 = vst.msk [vmem:[#allocation4 + $0x28] sm:$0xff] %vm291_vm9, %v551_v44 }
 0x1c3   : > { %v511_v46 = vpop.xlane.xlu1 %510 }
 0x1c4   : > { %v552_v47 = vmax.f32 %v536_v45, %v511_v46 }
 0x1c6   : > { %569 = vst.msk [vmem:[#allocation4 + $0x30] sm:$0xff] %vm291_vm9, %v552_v47 }
 0x1c7   : > { %v513_v49 = vpop.xlane.xlu1 %512 }
 0x1c8   : > { %v553_v50 = vmax.f32 %v537_v48, %v513_v49 }
 0x1ca   : > { %570 = vst.msk [vmem:[#allocation4 + $0x38] sm:$0xff] %vm291_vm9, %v553_v50 }
 0x1cb   : > { %v515_v52 = vpop.xlane.xlu1 %514 }
 0x1cc   : > { %v554_v53 = vmax.f32 %v538_v51, %v515_v52 }
 0x1ce   : > { %571 = vst.msk [vmem:[#allocation4 + $0x40] sm:$0xff] %vm291_vm9, %v554_v53 }
 0x1cf   : > { %v517_v55 = vpop.xlane.xlu1 %516 }
 0x1d0   : > { %v555_v56 = vmax.f32 %v539_v54, %v517_v55 }
 0x1d2   : > { %572 = vst.msk [vmem:[#allocation4 + $0x48] sm:$0xff] %vm291_vm9, %v555_v56 }
 0x1d3   : > { %v521_v58 = vpop.xlane.xlu1 %520 }
 0x1d4   : > { %v557_v59 = vmax.f32 %v541_v57, %v521_v58 }
 0x1d6   : > { %574 = vst.msk [vmem:[#allocation4 + $0x58] sm:$0xff] %vm291_vm9, %v557_v59 }
 0x1d7   : > { %v525_v61 = vpop.xlane.xlu1 %524 }
 0x1d8   : > { %v559_v62 = vmax.f32 %v543_v60, %v525_v61 }
 0x1da   : > { %576 = vst.msk [vmem:[#allocation4 + $0x68] sm:$0xff] %vm291_vm9, %v559_v62 }
 0x1db   : > { %v529_v0 = vpop.xlane.xlu1 %528 }
 0x1dc   : > { %v561_v1 = vmax.f32 %v545_v63, %v529_v0 }
 0x1de   : > { %578 = vst.msk [vmem:[#allocation4 + $0x78] sm:$0xff] %vm291_vm9, %v561_v1 }
 0x1df PF: > { %p1187_p5 = scmp.ne.s32.totalorder %s1368_s17, 1 }
 0x1e1   : > { %582 = sbr.rel (%p1187_p5) target bundleno = 877 (0x36d), region = 48 }
 0x1e6   : > { %v587_v19 = vld [vmem:[#allocation4 + $0x10] sm:$0xff]  ;;  %v585_v20 = vld [vmem:[#allocation4] sm:$0xff]  ;;  %v1382_v21 = vmov 0   ;;  %v588_v22 = vld [vmem:[#allocation4 + $0x18] sm:$0xff]  ;;  %vm1937_vm9 = vcmp.eq.s32.totalorder %v1452_v7, %v1467_v12  ;;  %vm1938_vm14 = vcmp.eq.s32.totalorder %v1452_v7, %v1473_v14  ;;  %vm1939_vm11 = vcmp.eq.s32.totalorder %v1452_v7, %v1482_v17 }
 0x1e7   : > { %1289 = vset.pattern.permute.xlu1 %v1382_v21  ;;  %1288 = vset.pattern.permute.xlu0 %v1382_v21  ;;  %v586_v23 = vld [vmem:[#allocation4 + $0x8] sm:$0xff]  ;;  %v589_v25 = vld [vmem:[#allocation4 + $0x20] sm:$0xff]  ;;  %v592_v26 = vld [vmem:[#allocation4 + $0x38] sm:$0xff]  ;;  %vm1940_vm15 = vcmp.eq.s32.totalorder %v1452_v7, %v1485_v18 }
 0x1e8   : > { %613 = vperm.xlu1 %1289, %v587_v19   ;;  %603 = vperm.xlu0 %1288, %v585_v20   ;;  %v590_v24 = vld [vmem:[#allocation4 + $0x28] sm:$0xff]  ;;  %v591_v27 = vld [vmem:[#allocation4 + $0x30] sm:$0xff]  ;;  %v593_v29 = vld [vmem:[#allocation4 + $0x40] sm:$0xff] }
 0x1e9   : > { %v594_v28 = vld [vmem:[#allocation4 + $0x48] sm:$0xff]  ;;  %v596_v30 = vld [vmem:[#allocation4 + $0x58] sm:$0xff]  ;;  %v595_v31 = vld [vmem:[#allocation4 + $0x50] sm:$0xff] }
 0x1ea   : > { %v598_v32 = vld [vmem:[#allocation4 + $0x68] sm:$0xff]  ;;  %v597_v33 = vld [vmem:[#allocation4 + $0x60] sm:$0xff]  ;;  %v600_v34 = vld [vmem:[#allocation4 + $0x78] sm:$0xff] }
 0x1eb   : > { %v599_v35 = vld [vmem:[#allocation4 + $0x70] sm:$0xff] }
 0x1ec   : > { %618 = vperm.xlu1 %1289, %v588_v22   ;;  %608 = vperm.xlu0 %1288, %v586_v23  }
 0x1f0   : > { %628 = vperm.xlu1 %1289, %v590_v24   ;;  %623 = vperm.xlu0 %1288, %v589_v25  }
 0x1f4   : > { %638 = vperm.xlu1 %1289, %v592_v26   ;;  %633 = vperm.xlu0 %1288, %v591_v27  }
 0x1f8   : > { %648 = vperm.xlu1 %1289, %v594_v28   ;;  %643 = vperm.xlu0 %1288, %v593_v29  }
 0x1fc   : > { %658 = vperm.xlu1 %1289, %v596_v30   ;;  %653 = vperm.xlu0 %1288, %v595_v31  }
 0x200   : > { %668 = vperm.xlu1 %1289, %v598_v32   ;;  %663 = vperm.xlu0 %1288, %v597_v33  }
 0x204   : > { %678 = vperm.xlu1 %1289, %v600_v34   ;;  %673 = vperm.xlu0 %1288, %v599_v35  }
 0x263   : > { %v614_v36 = vpop.permute.xlu1 %613  ;;  %v604_v37 = vpop.permute.xlu0 %603 }
 0x264   : > { %v681_v40 = vsel %vm267_vm0, %v604_v37, 0.0  ;;  %v683_v43 = vsel %vm269_vm2, %v614_v36, 0.0 }
 0x267   : > { %v619_v38 = vpop.permute.xlu1 %618  ;;  %v609_v39 = vpop.permute.xlu0 %608 }
 0x268   : > { %v682_v41 = vsel %vm268_vm1, %v609_v39, 0.0  ;;  %v684_v47 = vsel %vm270_vm3, %v619_v38, 0.0 }
 0x269   : > { %v697_v42 = vadd.f32 %v682_v41, %v681_v40  ;;  %v584_v41 = vld [vmem:[#allocation2] sm:$0x1] }
 0x26b   : > { %v698_v44 = vadd.f32 %v697_v42, %v683_v43  ;;  %v629_v45 = vpop.permute.xlu1 %628  ;;  %v624_v46 = vpop.permute.xlu0 %623 }
 0x26c   : > { %v685_v49 = vsel %vm271_vm4, %v624_v46, 0.0  ;;  %v686_v53 = vsel %vm272_vm5, %v629_v45, 0.0  ;;  %v726_v45 = vsub.s32 0, %v1435_v2 }
 0x26d   : > { %v699_v48 = vadd.f32 %v698_v44, %v684_v47 }
 0x26f   : > { %v700_v50 = vadd.f32 %v699_v48, %v685_v49  ;;  %v639_v51 = vpop.permute.xlu1 %638  ;;  %v634_v52 = vpop.permute.xlu0 %633 }
 0x270   : > { %v687_v55 = vsel %vm273_vm6, %v634_v52, 0.0  ;;  %v688_v59 = vsel %vm274_vm7, %v639_v51, 0.0 }
 0x271   : > { %v701_v54 = vadd.f32 %v700_v50, %v686_v53 }
 0x273   : > { %v702_v56 = vadd.f32 %v701_v54, %v687_v55  ;;  %v649_v57 = vpop.permute.xlu1 %648  ;;  %v644_v58 = vpop.permute.xlu0 %643 }
 0x274   : > { %v689_v61 = vsel %vm275_vm8, %v644_v58, 0.0  ;;  %v690_v1 = vsel %vm1937_vm9, %v649_v57, 0.0 }
 0x275   : > { %v703_v60 = vadd.f32 %v702_v56, %v688_v59 }
 0x277   : > { %v704_v62 = vadd.f32 %v703_v60, %v689_v61  ;;  %v659_v63 = vpop.permute.xlu1 %658  ;;  %v654_v0 = vpop.permute.xlu0 %653 }
 0x278   : > { %v691_v20 = vsel %vm277_vm10, %v654_v0, 0.0  ;;  %v692_v24 = vsel %vm1938_vm14, %v659_v63, 0.0  ;;  %vm1941_vm14 = vmmov %vm1939_vm11  ;;  %v778_v0 = vld [vmem:[#allocation5 + $0x8] sm:$0xff] }
 0x279   : > { %v705_v19 = vadd.f32 %v704_v62, %v690_v1  ;;  %v777_v1 = vld [vmem:[#allocation5] sm:$0xff] }
 0x27b   : > { %v706_v21 = vadd.f32 %v705_v19, %v691_v20  ;;  %v669_v22 = vpop.permute.xlu1 %668  ;;  %v664_v23 = vpop.permute.xlu0 %663 }
 0x27c   : > { %v693_v26 = vsel %vm1933_vm12, %v664_v23, 0.0  ;;  %v694_v29 = vsel %vm1932_vm13, %v669_v22, 0.0  ;;  %v781_v23 = vld [vmem:[#allocation5 + $0x20] sm:$0xff] }
 0x27d   : > { %v707_v25 = vadd.f32 %v706_v21, %v692_v24  ;;  %v779_v24 = vld [vmem:[#allocation5 + $0x10] sm:$0xff] }
 0x27f   : > { %v708_v27 = vadd.f32 %v707_v25, %v693_v26  ;;  %v674_v28 = vpop.permute.xlu0 %673  ;;  %v679_v30 = vpop.permute.xlu1 %678 }
 0x280   : > { %v695_v32 = vsel %vm1939_vm11, %v674_v28, 0.0  ;;  %v696_v34 = vsel %vm1940_vm15, %v679_v30, 0.0  ;;  %vm1942_vm11 = vcmp.eq.s32.totalorder %v1452_v7, %v1473_v14  ;;  %v780_v30 = vld [vmem:[#allocation5 + $0x18] sm:$0xff] }
 0x281   : > { %v709_v31 = vadd.f32 %v708_v27, %v694_v29  ;;  %v783_v29 = vld [vmem:[#allocation5 + $0x30] sm:$0xff] }
 0x283   : > { %v710_v33 = vadd.f32 %v709_v31, %v695_v32 }
 0x285   : > { %v711_v35 = vadd.f32 %v710_v33, %v696_v34 }
 0x287   : > { %v712_v36 = vrot.slane %v711_v35, 4 }
 0x289   : > { %v713_v37 = vadd.f32 %v712_v36, %v711_v35  ;;  %v785_v35 = vld [vmem:[#allocation5 + $0x40] sm:$0xff] }
 0x28b   : > { %v714_v38 = vrot.slane %v713_v37, 2 }
 0x28d   : > { %v715_v39 = vadd.f32 %v714_v38, %v713_v37  ;;  %v782_v38 = vld [vmem:[#allocation5 + $0x28] sm:$0xff] }
 0x28f   : > { %v716_v40 = vrot.slane %v715_v39, 1 }
 0x291   : > { %v717_v42 = vadd.f32 %v716_v40, %v715_v39 }
 0x293   : > { %v718_v43 = vsub.f32 %v584_v41, %v717_v42 }
 0x295   : > { %v719_v44 = vmul.f32 1.442695, %v718_v43  ;;  %v787_v43 = vld [vmem:[#allocation5 + $0x50] sm:$0xff] }
 0x297   : > { %1290 = vpow2.f32 %v719_v44 }
 0x2a4   : > { %v1291_v46 = vpop.eup %1290 }
 0x2a5   : > { %722 = vst [vmem:[#allocation3] sm:$0x1] %v1291_v46  ;;  %v727_v47 = vrot.slane %v1291_v46, %v726_v45  ;;  %v784_v46 = vld [vmem:[#allocation5 + $0x38] sm:$0xff] }
 0x2a7   : > { %v730_v48 = vsel %vm268_vm1, %v727_v47, 0.0  ;;  %v729_v49 = vsel %vm267_vm0, %v727_v47, 0.0  ;;  %v733_v50 = vsel %vm271_vm4, %v727_v47, 0.0  ;;  %v731_v51 = vsel %vm269_vm2, %v727_v47, 0.0 }
 0x2a8   : > { %747 = vadd.xlane.f32.xlu1 %v730_v48  ;;  %745 = vadd.xlane.f32.xlu0 %v729_v49  ;;  %v735_v52 = vsel %vm273_vm6, %v727_v47, 0.0  ;;  %v732_v53 = vsel %vm270_vm3, %v727_v47, 0.0  ;;  %v737_v54 = vsel %vm275_vm8, %v727_v47, 0.0  ;;  %v734_v55 = vsel %vm272_vm5, %v727_v47, 0.0 }
 0x2a9   : > { %v739_v56 = vsel %vm277_vm10, %v727_v47, 0.0  ;;  %v736_v57 = vsel %vm274_vm7, %v727_v47, 0.0  ;;  %v741_v58 = vsel %vm1933_vm12, %v727_v47, 0.0  ;;  %v738_v59 = vsel %vm1937_vm9, %v727_v47, 0.0 }
 0x2aa   : > { %v743_v60 = vsel %vm1941_vm14, %v727_v47, 0.0  ;;  %v740_v61 = vsel %vm1942_vm11, %v727_v47, 0.0  ;;  %v742_v62 = vsel %vm1932_vm13, %v727_v47, 0.0  ;;  %v744_v63 = vsel %vm1940_vm15, %v727_v47, 0.0 }
 0x2ab   : > { %vm809_vm9 = vcmask 7168  }
 0x2ac   : > { %753 = vadd.xlane.f32.xlu1 %v733_v50  ;;  %749 = vadd.xlane.f32.xlu0 %v731_v51  ;;  %v789_v51 = vld [vmem:[#allocation5 + $0x60] sm:$0xff] }
 0x2b0   : > { %757 = vadd.xlane.f32.xlu1 %v735_v52  ;;  %751 = vadd.xlane.f32.xlu0 %v732_v53 }
 0x2b4   : > { %761 = vadd.xlane.f32.xlu1 %v737_v54  ;;  %755 = vadd.xlane.f32.xlu0 %v734_v55  ;;  %v786_v54 = vld [vmem:[#allocation5 + $0x48] sm:$0xff] }
 0x2b8   : > { %765 = vadd.xlane.f32.xlu1 %v739_v56  ;;  %759 = vadd.xlane.f32.xlu0 %v736_v57 }
 0x2bc   : > { %769 = vadd.xlane.f32.xlu1 %v741_v58  ;;  %763 = vadd.xlane.f32.xlu0 %v738_v59  ;;  %v791_v59 = vld [vmem:[#allocation5 + $0x70] sm:$0xff] }
 0x2c0   : > { %773 = vadd.xlane.f32.xlu1 %v743_v60  ;;  %767 = vadd.xlane.f32.xlu0 %v740_v61 }
 0x2c4   : > { %771 = vadd.xlane.f32.xlu0 %v742_v62  ;;  %v788_v62 = vld [vmem:[#allocation5 + $0x58] sm:$0xff] }
 0x2c8   : > { %775 = vadd.xlane.f32.xlu0 %v744_v63 }
 0x331   : > { %v748_v19 = vpop.xlane.xlu1 %747  ;;  %v746_v20 = vpop.xlane.xlu0 %745 }
 0x332   : > { %v794_v21 = vadd.f32 %v778_v0, %v748_v19  ;;  %v793_v22 = vadd.f32 %v777_v1, %v746_v20 }
 0x334   : > { %811 = vst.msk [vmem:[#allocation5 + $0x8] sm:$0xff] %vm809_vm9, %v794_v21  ;;  %810 = vst.msk [vmem:[#allocation5] sm:$0xff] %vm809_vm9, %v793_v22 }
 0x335   : > { %v754_v25 = vpop.xlane.xlu1 %753  ;;  %v750_v26 = vpop.xlane.xlu0 %749 }
 0x336   : > { %v797_v27 = vadd.f32 %v781_v23, %v754_v25  ;;  %v795_v28 = vadd.f32 %v779_v24, %v750_v26  ;;  %v790_v26 = vld [vmem:[#allocation5 + $0x68] sm:$0xff] }
 0x338   : > { %814 = vst.msk [vmem:[#allocation5 + $0x20] sm:$0xff] %vm809_vm9, %v797_v27  ;;  %812 = vst.msk [vmem:[#allocation5 + $0x10] sm:$0xff] %vm809_vm9, %v795_v28 }
 0x339   : > { %v758_v31 = vpop.xlane.xlu1 %757  ;;  %v752_v32 = vpop.xlane.xlu0 %751 }
 0x33a   : > { %v799_v33 = vadd.f32 %v783_v29, %v758_v31  ;;  %v796_v34 = vadd.f32 %v780_v30, %v752_v32 }
 0x33b   : > { %v831_v36 = vld [vmem:[#allocation5 + $0x8] sm:$0xff]  ;;  %v830_v37 = vld [vmem:[#allocation5] sm:$0xff] }
 0x33c   : > { %1292 = vrcp.f32 %v831_v36  ;;  %816 = vst.msk [vmem:[#allocation5 + $0x30] sm:$0xff] %vm809_vm9, %v799_v33  ;;  %813 = vst.msk [vmem:[#allocation5 + $0x18] sm:$0xff] %vm809_vm9, %v796_v34  ;;  %vm847_vm14 = vcmp.gt.f32.partialorder %v831_v36, 0.0  ;;  %vm846_vm11 = vcmp.gt.f32.partialorder %v830_v37, 0.0 }
 0x33d   : > { %1294 = vrcp.f32 %v830_v37  ;;  %v762_v39 = vpop.xlane.xlu1 %761  ;;  %v756_v40 = vpop.xlane.xlu0 %755 }
 0x33e   : > { %v801_v41 = vadd.f32 %v785_v35, %v762_v39  ;;  %v798_v42 = vadd.f32 %v782_v38, %v756_v40  ;;  %v792_v35 = vld [vmem:[#allocation5 + $0x78] sm:$0xff] }
 0x33f   : > { %v834_v44 = vld [vmem:[#allocation5 + $0x20] sm:$0xff]  ;;  %v832_v45 = vld [vmem:[#allocation5 + $0x10] sm:$0xff] }
 0x340   : > { %1296 = vrcp.f32 %v834_v44  ;;  %818 = vst.msk [vmem:[#allocation5 + $0x40] sm:$0xff] %vm809_vm9, %v801_v41  ;;  %815 = vst.msk [vmem:[#allocation5 + $0x28] sm:$0xff] %vm809_vm9, %v798_v42  ;;  %vm850_vm15 = vcmp.gt.f32.partialorder %v834_v44, 0.0 }
 0x341   : > { %1298 = vrcp.f32 %v832_v45  ;;  %v766_v47 = vpop.xlane.xlu1 %765  ;;  %v760_v48 = vpop.xlane.xlu0 %759 }
 0x342   : > { %v803_v49 = vadd.f32 %v787_v43, %v766_v47  ;;  %v800_v50 = vadd.f32 %v784_v46, %v760_v48 }
 0x343   : > { %v836_v52 = vld [vmem:[#allocation5 + $0x30] sm:$0xff]  ;;  %v833_v53 = vld [vmem:[#allocation5 + $0x18] sm:$0xff] }
 0x344   : > { %1300 = vrcp.f32 %v836_v52  ;;  %820 = vst.msk [vmem:[#allocation5 + $0x50] sm:$0xff] %vm809_vm9, %v803_v49  ;;  %817 = vst.msk [vmem:[#allocation5 + $0x38] sm:$0xff] %vm809_vm9, %v800_v50 }
 0x345   : > { %1302 = vrcp.f32 %v833_v53  ;;  %v770_v55 = vpop.xlane.xlu1 %769  ;;  %v764_v56 = vpop.xlane.xlu0 %763 }
 0x346   : > { %v805_v57 = vadd.f32 %v789_v51, %v770_v55  ;;  %v802_v58 = vadd.f32 %v786_v54, %v764_v56 }
 0x347   : > { %v838_v60 = vld [vmem:[#allocation5 + $0x40] sm:$0xff]  ;;  %v1826_v61 = vld [vmem:[#allocation5 + $0x28] sm:$0xff] }
 0x348   : > { %1304 = vrcp.f32 %v838_v60  ;;  %822 = vst.msk [vmem:[#allocation5 + $0x60] sm:$0xff] %vm809_vm9, %v805_v57  ;;  %819 = vst.msk [vmem:[#allocation5 + $0x48] sm:$0xff] %vm809_vm9, %v802_v58  ;;  %vm851_vm13 = vcmp.gt.f32.partialorder %v1826_v61, 0.0 }
 0x349   : > { %v1293_v63 = vpop.eup %1292  ;;  %1306 = vrcp.f32 %v1826_v61  ;;  %v774_v0 = vpop.xlane.xlu1 %773 }
 0x34a   : > { %v768_v1 = vpop.xlane.xlu0 %767  ;;  %v1295_v19 = vpop.eup %1294  ;;  %v895_v20 = vsel %vm847_vm14, %v1293_v63, 0.0  ;;  %v807_v21 = vadd.f32 %v791_v59, %v774_v0  ;;  %vm848_vm14 = vcmp.gt.f32.partialorder %v832_v45, 0.0 }
 0x34b   : > { %v804_v22 = vadd.f32 %v788_v62, %v768_v1  ;;  %911 = vst.msk [vmem:[#allocation5 + $0x8] sm:$0xff] %vm809_vm9, %v895_v20  ;;  %v894_v23 = vsel %vm846_vm11, %v1295_v19, 0.0  ;;  %v840_v24 = vld [vmem:[#allocation5 + $0x50] sm:$0xff]  ;;  %v837_v25 = vld [vmem:[#allocation5 + $0x38] sm:$0xff]  ;;  %vm852_vm11 = vcmp.gt.f32.partialorder %v836_v52, 0.0 }
 0x34c   : > { %910 = vst.msk [vmem:[#allocation5] sm:$0xff] %vm809_vm9, %v894_v23  ;;  %1308 = vrcp.f32 %v840_v24  ;;  %824 = vst.msk [vmem:[#allocation5 + $0x70] sm:$0xff] %vm809_vm9, %v807_v21 }
 0x34d   : > { %821 = vst.msk [vmem:[#allocation5 + $0x58] sm:$0xff] %vm809_vm9, %v804_v22  ;;  %v1297_v27 = vpop.eup %1296  ;;  %1310 = vrcp.f32 %v837_v25 }
 0x34e   : > { %v772_v28 = vpop.xlane.xlu0 %771  ;;  %v1299_v29 = vpop.eup %1298  ;;  %v898_v30 = vsel %vm850_vm15, %v1297_v27, 0.0  ;;  %vm849_vm15 = vcmp.gt.f32.partialorder %v833_v53, 0.0 }
 0x34f   : > { %v806_v31 = vadd.f32 %v790_v26, %v772_v28  ;;  %914 = vst.msk [vmem:[#allocation5 + $0x20] sm:$0xff] %vm809_vm9, %v898_v30  ;;  %v896_v32 = vsel %vm848_vm14, %v1299_v29, 0.0  ;;  %v842_v33 = vld [vmem:[#allocation5 + $0x60] sm:$0xff]  ;;  %v839_v34 = vld [vmem:[#allocation5 + $0x48] sm:$0xff]  ;;  %vm854_vm14 = vcmp.gt.f32.partialorder %v838_v60, 0.0 }
 0x350   : > { %912 = vst.msk [vmem:[#allocation5 + $0x10] sm:$0xff] %vm809_vm9, %v896_v32  ;;  %1312 = vrcp.f32 %v842_v33 }
 0x351   : > { %823 = vst.msk [vmem:[#allocation5 + $0x68] sm:$0xff] %vm809_vm9, %v806_v31  ;;  %v1301_v36 = vpop.eup %1300  ;;  %1314 = vrcp.f32 %v839_v34 }
 0x352   : > { %v776_v37 = vpop.xlane.xlu0 %775  ;;  %v1303_v38 = vpop.eup %1302  ;;  %v900_v39 = vsel %vm852_vm11, %v1301_v36, 0.0  ;;  %vm856_vm11 = vcmp.gt.f32.partialorder %v840_v24, 0.0 }
 0x353   : > { %v808_v40 = vadd.f32 %v792_v35, %v776_v37  ;;  %916 = vst.msk [vmem:[#allocation5 + $0x30] sm:$0xff] %vm809_vm9, %v900_v39  ;;  %v897_v41 = vsel %vm849_vm15, %v1303_v38, 0.0  ;;  %v844_v42 = vld [vmem:[#allocation5 + $0x70] sm:$0xff]  ;;  %vm853_vm15 = vcmp.gt.f32.partialorder %v837_v25, 0.0 }
 0x354   : > { %v841_v43 = vld [vmem:[#allocation5 + $0x58] sm:$0xff]  ;;  %913 = vst.msk [vmem:[#allocation5 + $0x18] sm:$0xff] %vm809_vm9, %v897_v41  ;;  %1316 = vrcp.f32 %v844_v42 }
 0x355   : > { %825 = vst.msk [vmem:[#allocation5 + $0x78] sm:$0xff] %vm809_vm9, %v808_v40  ;;  %v1305_v44 = vpop.eup %1304  ;;  %1318 = vrcp.f32 %v841_v43  ;;  %vm857_vm12 = vcmp.gt.f32.partialorder %v841_v43, 0.0 }
 0x356   : > { %v1307_v45 = vpop.eup %1306  ;;  %v902_v46 = vsel %vm854_vm14, %v1305_v44, 0.0  ;;  %vm858_vm14 = vcmp.gt.f32.partialorder %v842_v33, 0.0 }
 0x357   : > { %918 = vst.msk [vmem:[#allocation5 + $0x40] sm:$0xff] %vm809_vm9, %v902_v46  ;;  %v899_v47 = vsel %vm851_vm13, %v1307_v45, 0.0  ;;  %vm855_vm13 = vcmp.gt.f32.partialorder %v839_v34, 0.0 }
 0x358   : > { %v843_v48 = vld [vmem:[#allocation5 + $0x68] sm:$0xff]  ;;  %915 = vst.msk [vmem:[#allocation5 + $0x28] sm:$0xff] %vm809_vm9, %v899_v47 }
 0x359   : > { %1320 = vrcp.f32 %v843_v48  ;;  %v1309_v49 = vpop.eup %1308 }
 0x35a   : > { %v1311_v50 = vpop.eup %1310  ;;  %v904_v51 = vsel %vm856_vm11, %v1309_v49, 0.0  ;;  %vm860_vm11 = vcmp.gt.f32.partialorder %v844_v42, 0.0 }
 0x35b   : > { %920 = vst.msk [vmem:[#allocation5 + $0x50] sm:$0xff] %vm809_vm9, %v904_v51  ;;  %v901_v52 = vsel %vm853_vm15, %v1311_v50, 0.0  ;;  %vm859_vm15 = vcmp.gt.f32.partialorder %v843_v48, 0.0 }
 0x35c   : > { %v845_v53 = vld [vmem:[#allocation5 + $0x78] sm:$0xff]  ;;  %917 = vst.msk [vmem:[#allocation5 + $0x38] sm:$0xff] %vm809_vm9, %v901_v52 }
 0x35d   : > { %1322 = vrcp.f32 %v845_v53  ;;  %v1313_v54 = vpop.eup %1312 }
 0x35e   : > { %v1315_v55 = vpop.eup %1314  ;;  %v906_v56 = vsel %vm858_vm14, %v1313_v54, 0.0  ;;  %vm861_vm14 = vcmp.gt.f32.partialorder %v845_v53, 0.0 }
 0x35f   : > { %922 = vst.msk [vmem:[#allocation5 + $0x60] sm:$0xff] %vm809_vm9, %v906_v56  ;;  %v903_v57 = vsel %vm855_vm13, %v1315_v55, 0.0 }
 0x360   : > { %919 = vst.msk [vmem:[#allocation5 + $0x48] sm:$0xff] %vm809_vm9, %v903_v57 }
 0x361   : > { %v1317_v58 = vpop.eup %1316 }
 0x362   : > { %v1319_v59 = vpop.eup %1318  ;;  %v908_v60 = vsel %vm860_vm11, %v1317_v58, 0.0 }
 0x363   : > { %924 = vst.msk [vmem:[#allocation5 + $0x70] sm:$0xff] %vm809_vm9, %v908_v60  ;;  %v905_v61 = vsel %vm857_vm12, %v1319_v59, 0.0 }
 0x364   : > { %921 = vst.msk [vmem:[#allocation5 + $0x58] sm:$0xff] %vm809_vm9, %v905_v61 }
 0x366   : > { %v1321_v62 = vpop.eup %1320 }
 0x367   : > { %v907_v63 = vsel %vm859_vm15, %v1321_v62, 0.0 }
 0x368   : > { %923 = vst.msk [vmem:[#allocation5 + $0x68] sm:$0xff] %vm809_vm9, %v907_v63 }
 0x36a   : > { %v1323_v0 = vpop.eup %1322 }
 0x36b   : > { %v909_v1 = vsel %vm861_vm14, %v1323_v0, 0.0 }
 0x36c   : > { %925 = vst.msk [vmem:[#allocation5 + $0x78] sm:$0xff] %vm809_vm9, %v909_v1 }
 0x36d PF: > { %p1188_p6 = scmp.ne.s32.totalorder %s1368_s17, 2 }
 0x36f   : > { %929 = sbr.rel (%p1188_p6) target bundleno = 1060 (0x424), region = 56 }
 0x374   : > { %v934_v19 = vld [vmem:[#allocation5 + $0x10] sm:$0xff]  ;;  %v932_v20 = vld [vmem:[#allocation5] sm:$0xff]  ;;  %v1383_v21 = vmov 0   ;;  %v935_v22 = vld [vmem:[#allocation5 + $0x18] sm:$0xff] }
 0x375   : > { %1325 = vset.pattern.permute.xlu1 %v1383_v21  ;;  %1324 = vset.pattern.permute.xlu0 %v1383_v21  ;;  %v933_v23 = vld [vmem:[#allocation5 + $0x8] sm:$0xff]  ;;  %v936_v25 = vld [vmem:[#allocation5 + $0x20] sm:$0xff]  ;;  %v939_v26 = vld [vmem:[#allocation5 + $0x38] sm:$0xff] }
 0x376   : > { %960 = vperm.xlu1 %1325, %v934_v19   ;;  %950 = vperm.xlu0 %1324, %v932_v20   ;;  %v937_v24 = vld [vmem:[#allocation5 + $0x28] sm:$0xff]  ;;  %v938_v27 = vld [vmem:[#allocation5 + $0x30] sm:$0xff]  ;;  %v940_v29 = vld [vmem:[#allocation5 + $0x40] sm:$0xff] }
 0x377   : > { %v941_v28 = vld [vmem:[#allocation5 + $0x48] sm:$0xff]  ;;  %v943_v30 = vld [vmem:[#allocation5 + $0x58] sm:$0xff]  ;;  %v942_v31 = vld [vmem:[#allocation5 + $0x50] sm:$0xff] }
 0x378   : > { %v945_v32 = vld [vmem:[#allocation5 + $0x68] sm:$0xff]  ;;  %v944_v33 = vld [vmem:[#allocation5 + $0x60] sm:$0xff]  ;;  %v947_v34 = vld [vmem:[#allocation5 + $0x78] sm:$0xff] }
 0x379   : > { %v946_v35 = vld [vmem:[#allocation5 + $0x70] sm:$0xff] }
 0x37a   : > { %965 = vperm.xlu1 %1325, %v935_v22   ;;  %955 = vperm.xlu0 %1324, %v933_v23  }
 0x37e   : > { %975 = vperm.xlu1 %1325, %v937_v24   ;;  %970 = vperm.xlu0 %1324, %v936_v25  }
 0x382   : > { %985 = vperm.xlu1 %1325, %v939_v26   ;;  %980 = vperm.xlu0 %1324, %v938_v27  }
 0x386   : > { %995 = vperm.xlu1 %1325, %v941_v28   ;;  %990 = vperm.xlu0 %1324, %v940_v29   ;;  %v931_v28 = vld [vmem:[#allocation3] sm:$0x1] }
 0x38a   : > { %1005 = vperm.xlu1 %1325, %v943_v30   ;;  %1000 = vperm.xlu0 %1324, %v942_v31  }
 0x38e   : > { %1015 = vperm.xlu1 %1325, %v945_v32   ;;  %1010 = vperm.xlu0 %1324, %v944_v33  }
 0x392   : > { %1025 = vperm.xlu1 %1325, %v947_v34   ;;  %1020 = vperm.xlu0 %1324, %v946_v35  }
 0x3f1   : > { %v961_v36 = vpop.permute.xlu1 %960  ;;  %v951_v37 = vpop.permute.xlu0 %950 }
 0x3f2   : > { %v1028_v40 = vsel %vm267_vm0, %v951_v37, 0.0  ;;  %v1030_v43 = vsel %vm269_vm2, %v961_v36, 0.0  ;;  %vm1943_vm0 = vcmp.eq.s32.totalorder %v1452_v7, %v1467_v12  ;;  %vm1945_vm2 = vcmp.eq.s32.totalorder %v1452_v7, %v1476_v15 }
 0x3f5   : > { %v966_v38 = vpop.permute.xlu1 %965  ;;  %v956_v39 = vpop.permute.xlu0 %955 }
 0x3f6   : > { %v1029_v41 = vsel %vm268_vm1, %v956_v39, 0.0  ;;  %v1031_v47 = vsel %vm270_vm3, %v966_v38, 0.0  ;;  %vm1944_vm1 = vcmp.eq.s32.totalorder %v1452_v7, %v1473_v14  ;;  %vm1946_vm3 = vcmp.eq.s32.totalorder %v1452_v7, %v1479_v16 }
 0x3f7   : > { %v1044_v42 = vadd.f32 %v1029_v41, %v1028_v40 }
 0x3f9   : > { %v1045_v44 = vadd.f32 %v1044_v42, %v1030_v43  ;;  %v976_v45 = vpop.permute.xlu1 %975  ;;  %v971_v46 = vpop.permute.xlu0 %970 }
 0x3fa   : > { %v1032_v2 = vsel %vm271_vm4, %v971_v46, 0.0  ;;  %v1033_v4 = vsel %vm272_vm5, %v976_v45, 0.0  ;;  %vm1947_vm4 = vcmp.eq.s32.totalorder %v1452_v7, %v1482_v17  ;;  %vm1948_vm5 = vcmp.eq.s32.totalorder %v1452_v7, %v1485_v18 }
 0x3fb   : > { %v1046_v48 = vadd.f32 %v1045_v44, %v1031_v47 }
 0x3fd   : > { %v1047_v49 = vadd.f32 %v1046_v48, %v1032_v2  ;;  %v986_v3 = vpop.permute.xlu1 %985  ;;  %v981_v50 = vpop.permute.xlu0 %980 }
 0x3fe   : > { %v1034_v52 = vsel %vm273_vm6, %v981_v50, 0.0  ;;  %v1035_v6 = vsel %vm274_vm7, %v986_v3, 0.0 }
 0x3ff   : > { %v1048_v51 = vadd.f32 %v1047_v49, %v1033_v4 }
 0x401   : > { %v1049_v53 = vadd.f32 %v1048_v51, %v1034_v52  ;;  %v996_v5 = vpop.permute.xlu1 %995  ;;  %v991_v54 = vpop.permute.xlu0 %990 }
 0x402   : > { %v1036_v56 = vsel %vm275_vm8, %v991_v54, 0.0  ;;  %v1037_v9 = vsel %vm1943_vm0, %v996_v5, 0.0 }
 0x403   : > { %v1050_v55 = vadd.f32 %v1049_v53, %v1035_v6 }
 0x405   : > { %v1051_v57 = vadd.f32 %v1050_v55, %v1036_v56  ;;  %v1006_v8 = vpop.permute.xlu1 %1005  ;;  %v1001_v58 = vpop.permute.xlu0 %1000 }
 0x406   : > { %v1038_v60 = vsel %vm277_vm10, %v1001_v58, 0.0  ;;  %v1039_v11 = vsel %vm1944_vm1, %v1006_v8, 0.0 }
 0x407   : > { %v1052_v59 = vadd.f32 %v1051_v57, %v1037_v9 }
 0x409   : > { %v1053_v61 = vadd.f32 %v1052_v59, %v1038_v60  ;;  %v1016_v10 = vpop.permute.xlu1 %1015  ;;  %v1011_v62 = vpop.permute.xlu0 %1010 }
 0x40a   : > { %v1040_v0 = vsel %vm1945_vm2, %v1011_v62, 0.0  ;;  %v1041_v19 = vsel %vm1946_vm3, %v1016_v10, 0.0 }
 0x40b   : > { %v1054_v63 = vadd.f32 %v1053_v61, %v1039_v11 }
 0x40d   : > { %v1055_v1 = vadd.f32 %v1054_v63, %v1040_v0  ;;  %v1021_v12 = vpop.permute.xlu0 %1020  ;;  %v1026_v13 = vpop.permute.xlu1 %1025 }
 0x40e   : > { %v1042_v21 = vsel %vm1947_vm4, %v1021_v12, 0.0  ;;  %v1043_v14 = vsel %vm1948_vm5, %v1026_v13, 0.0 }
 0x40f   : > { %v1056_v20 = vadd.f32 %v1055_v1, %v1041_v19 }
 0x411   : > { %v1057_v22 = vadd.f32 %v1056_v20, %v1042_v21 }
 0x413   : > { %v1058_v23 = vadd.f32 %v1057_v22, %v1043_v14 }
 0x415   : > { %v1059_v15 = vrot.slane %v1058_v23, 4 }
 0x417   : > { %v1060_v24 = vadd.f32 %v1059_v15, %v1058_v23 }
 0x419   : > { %v1061_v25 = vrot.slane %v1060_v24, 2 }
 0x41b   : > { %v1062_v26 = vadd.f32 %v1061_v25, %v1060_v24 }
 0x41d   : > { %v1063_v27 = vrot.slane %v1062_v26, 1 }
 0x41f   : > { %v1064_v16 = vadd.f32 %v1063_v27, %v1062_v26 }
 0x421   : > { %v1065_v29 = vmul.f32 %v1064_v16, %v931_v28 }
 0x423   : > { %1066 = vst [vmem:[#allocation7] sm:$0x1] %v1065_v29 }
 0x424 PF: > { %p1903_p7 = scmp.eq.s32.totalorder %s1161_s2, 2  ;;  %s1384_s11 = smov [#allocation7]  }
 0x425   : > { %s1082_s12 = sshll.u32 %s1384_s11, 4  ;;  %s1083_s12 = int_to_ptr.vmem [resolvable:$true] %s1082_s12 }
 0x426   : > { %s1326_s13 = scalar_lea.vmem %s1083_s12, 16  ;;  %s1332_s14 = scalar_lea.vmem %s1083_s12, 32 }
 0x427   : > { %p1327_p8 = scmp.ne.s32.totalorder %s1083_s12, %s1326_s13  ;;  %p1333_p11 = scmp.lt.s32.totalorder %s1083_s12, %s1083_s12 }
 0x428   : > { %p1334_p12 = scmp.lt.s32.totalorder %s1332_s14, %s1326_s13 }
 0x429   : > { %p1328_p9 = pnand %p1327_p8, %p1903_p7 }
 0x42a   : > { %p1335_p13 = por %p1334_p12, %p1333_p11 }
 0x42b   : > { %p1329_p10 = pneg %p1328_p9 }
 0x42d   : > { %p1336_p0 = pnand %p1335_p13, %p1329_p10 }
 0x42f   : > { %1339 = shalt.err (!%p1336_p0)
}
 0x430   : > { %1246 = dma.vmem_to_hbm [thread:$0]  (%p1903_p7), %s1083_s12, 16, %s1930_s4, [#allocation8]  }
 0x431 PF: > { %p1254_p1 = scmp.ge.s32.totalorder %s1376_s19, 2  ;;  %p1255_p2 = scmp.eq.s32.totalorder %s1162_s20, 2 }
 0x433   : > { %p1250_p3 = pnand %p1255_p2, %p1254_p1 }
 0x435   : > { %p1251_p4 = pneg %p1250_p3 }
 0x437   : > { %1363 = dma.done.wait (%p1251_p4), [#allocation8], 16  }
 0x438   : > { %1365 = vsyncadd (%p1251_p4), [#allocation8], 4294967280  ;;  %s19_s19 = sadd.s32 1, %s1376_s19   ;;  %s1950_s17 = smov %s1372_s18 }
 0x439   : > { %p16_p5 = scmp.ge.s32.totalorder %s19_s19, 5   ;;  %s1951_s18 = smov %s1953_s21 }
 0x43b   :  { %18 = sbr.rel (!%p16_p5) target bundleno = 6 (0x6), region = 98 }
 0x440   :  { %1099 = vsyncpa [#allocation8], 1 }
 0x441   :  { %1101 = vsyncpa [#allocation8 + $0x1], 1 }

</bundles_post_ra>
